<compile_context>
chip_gen: v5e
topology: v5e:2x2
jax: 0.10.0
libtpu: 0.0.40
codegen_flags: <defaults>
</compile_context>

<pallas_src>
import jax
import jax.numpy as jnp
from jax.experimental import pallas as pl
from jax.experimental.pallas import tpu as pltpu


def _round_up(x, m):
    return ((x + m - 1) // m) * m


def _vmem_capacity_bytes():
    """Physical VMEM of the local TPU (128 MiB v5e/v6e, 64 MiB v7x); conservative fallback."""
    try:
        cap = getattr(pltpu.get_tpu_info(), "vmem_capacity_bytes", None)
        if cap:
            return int(cap)
    except Exception:
        pass
    return 64 * 1024 * 1024


def _choose_tile_bv(bv_pad, vmem_cap):
    """Largest 128-multiple divisor of bv_pad, capped per generation (512 / 1024 lanes)."""
    cap = 1024 if vmem_cap > 64 * 1024 * 1024 else 512
    n128 = bv_pad // 128
    tile = 128
    for d in range(1, n128 + 1):
        if n128 % d == 0 and 128 * d <= cap:
            tile = 128 * d
    return tile


def _view_transform_kernel(x_ref, w1_ref, b1_ref, w2_ref, b2_ref, o_ref, h_ref):
    # x_ref : (B, 1, C, fv_dim)   f32   one view, all batches/channels
    # w1_ref: (fv_dim, bv_pad)    bf16  (per-view dim squeezed via None block dim)
    # b1_ref: (1, bv_pad)         f32
    # w2_ref: (bv_pad, tile_bv)   bf16  one bv tile of the second layer
    # b2_ref: (1, tile_bv)        f32
    # o_ref : (B, 1, C, tile_bv)  f32
    # h_ref : (B*C, bv_pad)       f32   scratch: first-layer activations carried
    #                                   across the bv-tile grid axis.
    B, _, C, fv_dim = x_ref.shape

    # Layer 1 runs once per view (bv tile 0); its output is reused by every bv tile.
    @pl.when(pl.program_id(1) == 0)
    def _():
        x = x_ref[...].reshape(B * C, fv_dim).astype(jnp.bfloat16)
        h = jnp.dot(x, w1_ref[...], preferred_element_type=jnp.float32) + b1_ref[...]
        h_ref[...] = jnp.maximum(h, 0.0)

    # Layer 2 for the current bv tile: single (B*C, bv_pad) @ (bv_pad, tile_bv).
    y = jnp.dot(h_ref[...].astype(jnp.bfloat16), w2_ref[...],
                preferred_element_type=jnp.float32) + b2_ref[...]
    y = jnp.maximum(y, 0.0)
    o_ref[...] = y.reshape(B, 1, C, y.shape[-1]).astype(o_ref.dtype)


def view_transformation_pallas(feat, params, bv_size):
    """feat: (B, N, C, H, W) float32. params: per-view weights stored as (in, out)."""
    B, N, C, H, W = feat.shape
    fv_dim = H * W
    bv_h, bv_w = bv_size
    bv_dim = bv_h * bv_w

    vmem_cap = _vmem_capacity_bytes()

    # Lane-dense output: pad bv only to a multiple of 128; tile_bv divides bv_pad
    # exactly, so no zero-padded w2 columns are streamed from HBM.
    bv_pad = _round_up(bv_dim, 128)
    tile_bv = _choose_tile_bv(bv_pad, vmem_cap)
    nbv = bv_pad // tile_bv
    pad = bv_pad - bv_dim

    # Free reshape (merge trailing dims) -- no transpose, no extra HBM pass.
    x = feat.reshape(B, N, C, fv_dim)

    w1, b1 = params["w1"], params["b1"]          # (N, fv_dim, bv_dim), (N, bv_dim)
    w2, b2 = params["w2"], params["b2"]          # (N, bv_dim, bv_dim), (N, bv_dim)
    if pad:
        w1 = jnp.pad(w1, ((0, 0), (0, 0), (0, pad)))
        b1 = jnp.pad(b1, ((0, 0), (0, pad)))
        w2 = jnp.pad(w2, ((0, 0), (0, pad), (0, pad)))
        b2 = jnp.pad(b2, ((0, 0), (0, pad)))

    # Weights streamed as bf16 (a real model would store them in bf16); biases f32.
    # TODO(synk): int8 (v5e/v6e) / fp8 (v7x) weight quantization would halve the
    # dominant HBM weight traffic if accuracy permits.
    w1 = w1.astype(jnp.bfloat16)
    w2 = w2.astype(jnp.bfloat16)
    b1 = b1.reshape(N, 1, bv_pad).astype(jnp.float32)
    b2 = b2.reshape(N, 1, bv_pad).astype(jnp.float32)

    # --- Generation-aware VMEM budget -------------------------------------------
    x_blk = B * C * fv_dim * 4
    b1_blk = 8 * bv_pad * 4
    w1_blk = fv_dim * bv_pad * 2
    w2_blk = bv_pad * tile_bv * 2
    b2_blk = 8 * tile_bv * 4
    o_blk = B * C * tile_bv * 4
    h_scr = B * C * bv_pad * 4

    def _need(view_bufs, w1_bufs):
        return (view_bufs * (x_blk + b1_blk) + w1_bufs * w1_blk
                + 2 * (w2_blk + b2_blk + o_blk) + h_scr)

    budget = int(vmem_cap * 0.9)
    if _need(3, 3) <= budget // 2:
        view_bufs, w1_bufs = 3, 3   # deep lookahead: hide the per-view w1/x fetch
    elif _need(2, 2) <= budget:
        view_bufs, w1_bufs = 2, 2   # default double buffering
    else:
        view_bufs, w1_bufs = 2, 1   # v7x / huge shapes: single-buffer the big w1
        # TODO(synk): if even _need(2, 1) exceeds VMEM, tile w1's bv columns too.

    vmem_limit = int(min(budget,
                         max(int(_need(view_bufs, w1_bufs) * 1.3), 16 * 2**20)
                         + 4 * 2**20))

    # TODO(synk): when B*C grows past ~512 rows, add a C-tile grid axis (with weight
    # index_maps independent of it) so the x/out blocks and h scratch stay bounded.

    def _run(vb, wb):
        def spec(shape, index_map, bufs):
            if bufs == 2:
                return pl.BlockSpec(shape, index_map)
            return pl.BlockSpec(shape, index_map, pipeline_mode=pl.Buffered(bufs))

        return pl.pallas_call(
            _view_transform_kernel,
            out_shape=jax.ShapeDtypeStruct((B, N, C, bv_pad), jnp.float32),
            grid_spec=pltpu.PrefetchScalarGridSpec(
                num_scalar_prefetch=0,
                grid=(N, nbv),
                in_specs=[
                    # x / w1 / b1: per-view, independent of the bv tile (resident
                    # across bv tiles; only re-fetched at view boundaries).
                    spec((B, 1, C, fv_dim), lambda i, j: (0, i, 0, 0), vb),
                    spec((None, fv_dim, bv_pad), lambda i, j: (i, 0, 0), wb),
                    spec((None, 1, bv_pad), lambda i, j: (i, 0, 0), vb),
                    # w2 / b2: per-view, one bv tile of output columns.
                    pl.BlockSpec((None, bv_pad, tile_bv), lambda i, j: (i, 0, j)),
                    pl.BlockSpec((None, 1, tile_bv), lambda i, j: (i, 0, j)),
                ],
                out_specs=pl.BlockSpec((B, 1, C, tile_bv),
                                       lambda i, j: (0, i, 0, j)),
                scratch_shapes=[pltpu.VMEM((B * C, bv_pad), jnp.float32)],
            ),
            compiler_params=pltpu.CompilerParams(
                dimension_semantics=("parallel", "arbitrary"),
                vmem_limit_bytes=vmem_limit,
            ),
        )(x, w1, b1, w2, b2)

    try:
        out_pad = _run(view_bufs, w1_bufs)
    except Exception:
        if (view_bufs, w1_bufs) == (2, 2):
            raise
        # Fallback if this JAX build's pallas_call pipeline rejects pipeline_mode.
        out_pad = _run(2, 2)

    # Slice off lane padding (no-op when bv_dim is 128-aligned) and split the bv
    # dim back into (bv_h, bv_w) -- both transpose-free.
    return out_pad[..., :bv_dim].reshape(B, N, C, bv_h, bv_w)


def make_params(key, n_views, fv_dim, bv_dim, dtype=jnp.float32):
    """Deterministic synthetic parameters (stored pre-transposed: (in, out))."""
    ks = jax.random.split(key, 4)
    scale1 = (1.0 / jnp.sqrt(fv_dim)).astype(dtype)
    scale2 = (1.0 / jnp.sqrt(bv_dim)).astype(dtype)
    return {
        "w1": jax.random.normal(ks[0], (n_views, fv_dim, bv_dim), dtype) * scale1,
        "b1": jax.random.normal(ks[1], (n_views, bv_dim), dtype) * 0.01,
        "w2": jax.random.normal(ks[2], (n_views, bv_dim, bv_dim), dtype) * scale2,
        "b2": jax.random.normal(ks[3], (n_views, bv_dim), dtype) * 0.01,
    }


def view_transformation_ref(feat, params, bv_size):
    """Pure-JAX f32 reference mirroring the PyTorch forward."""
    B, N, C, H, W = feat.shape
    bv_h, bv_w = bv_size
    x = feat.reshape(B, N, C, H * W)
    outs = []
    for i in range(N):
        h = jnp.maximum(x[:, i] @ params["w1"][i] + params["b1"][i], 0.0)
        y = jnp.maximum(h @ params["w2"][i] + params["b2"][i], 0.0)
        outs.append(y.reshape(B, C, bv_h, bv_w))
    return jnp.stack(outs, axis=1)


def view_transformation_ref_bf16(feat, params, bv_size):
    """Reference mirroring the kernel's bf16 quantization points (MXU inputs only)."""
    B, N, C, H, W = feat.shape
    bv_h, bv_w = bv_size
    q = lambda a: a.astype(jnp.bfloat16).astype(jnp.float32)
    x = q(feat.reshape(B, N, C, H * W))
    w1, w2 = q(params["w1"]), q(params["w2"])
    outs = []
    for i in range(N):
        h = jnp.maximum(x[:, i] @ w1[i] + params["b1"][i], 0.0)
        y = jnp.maximum(q(h) @ w2[i] + params["b2"][i], 0.0)
        outs.append(y.reshape(B, C, bv_h, bv_w))
    return jnp.stack(outs, axis=1)


if __name__ == "__main__":
    # Small but Pallas-friendly shapes: fv_dim = 8*32 = 256, bv_dim = 8*16 = 128,
    # C = 8 so the in-kernel (B,1,C,fv)->(B*C,fv) reshape is layout-free.
    B, N, C = 2, 6, 8
    fv_size = (8, 32)
    bv_size = (8, 16)
    H, W = fv_size
    fv_dim = H * W
    bv_dim = bv_size[0] * bv_size[1]

    key = jax.random.PRNGKey(0)
    k_feat, k_par = jax.random.split(key)
    feat = jax.random.normal(k_feat, (B, N, C, H, W), jnp.float32)
    params = make_params(k_par, N, fv_dim, bv_dim)

    out = view_transformation_pallas(feat, params, bv_size)
    out = jax.block_until_ready(out)
    assert out.shape == (B, N, C, bv_size[0], bv_size[1])

    # Tight check against a reference with matching bf16 quantization points.
    ref_q = view_transformation_ref_bf16(feat, params, bv_size)
    err_q = jnp.max(jnp.abs(out - ref_q))
    assert jnp.allclose(out, ref_q, atol=2e-2, rtol=2e-2), f"bf16-ref err={err_q}"

    # Loose check against the pure-f32 PyTorch-mirroring reference.
    ref = view_transformation_ref(feat, params, bv_size)
    err = jnp.max(jnp.abs(out - ref))
    assert jnp.allclose(out, ref, atol=1e-1, rtol=1e-1), f"f32-ref err={err}"

    print("KERNEL_OK")
</pallas_src>

<mosaic_0001>
module attributes {stable_mosaic.version = 11 : i64} {
  func.func @_view_transform_kernel(%arg0: i32, %arg1: i32, %arg2: memref<2x1x8x256xf32, #tpu.memory_space<vmem>>, %arg3: memref<1x256x128xbf16, #tpu.memory_space<vmem>>, %arg4: memref<1x1x128xf32, #tpu.memory_space<vmem>>, %arg5: memref<1x128x128xbf16, #tpu.memory_space<vmem>>, %arg6: memref<1x1x128xf32, #tpu.memory_space<vmem>>, %arg7: memref<2x1x8x128xf32, #tpu.memory_space<vmem>>, %arg8: memref<16x128xf32, #tpu.memory_space<vmem>>) attributes {dimension_semantics = [#tpu.dimension_semantics<parallel>, #tpu.dimension_semantics<arbitrary>], iteration_bounds = array<i64: 6, 1>, scalar_prefetch = 0 : i64, scratch_operands = 1 : i64, tpu.core_type = #tpu.core_type<tc>, window_params = [{transform_indices = @transform_0, window_bounds = array<i64: 2, 1, 8, 256>}, {transform_indices = @transform_1, window_bounds = array<i64: 1, 256, 128>}, {transform_indices = @transform_2, window_bounds = array<i64: 1, 1, 128>}, {transform_indices = @transform_3, window_bounds = array<i64: 1, 128, 128>}, {transform_indices = @transform_4, window_bounds = array<i64: 1, 1, 128>}, {transform_indices = @transform_5, window_bounds = array<i64: 2, 1, 8, 128>}]} {
    %c0_i32 = arith.constant 0 : i32
    %0 = arith.cmpi eq, %arg1, %c0_i32 : i32
    %1 = arith.extui %0 : i1 to i32
    %c0_i32_0 = arith.constant 0 : i32
    %2 = arith.cmpi ne, %1, %c0_i32_0 : i32
    scf.if %2 {
      %c0_13 = arith.constant 0 : index
      %c0_14 = arith.constant 0 : index
      %c0_15 = arith.constant 0 : index
      %c0_16 = arith.constant 0 : index
      %16 = vector.load %arg2[%c0_13, %c0_14, %c0_15, %c0_16] : memref<2x1x8x256xf32, #tpu.memory_space<vmem>>, vector<2x1x8x256xf32>
      %17 = vector.shape_cast %16 : vector<2x1x8x256xf32> to vector<16x256xf32>
      %18 = arith.truncf %17 : vector<16x256xf32> to vector<16x256xbf16>
      %c0_17 = arith.constant 0 : index
      %c0_18 = arith.constant 0 : index
      %c0_19 = arith.constant 0 : index
      %19 = vector.load %arg3[%c0_17, %c0_18, %c0_19] : memref<1x256x128xbf16, #tpu.memory_space<vmem>>, vector<1x256x128xbf16>
      %20 = vector.shape_cast %19 : vector<1x256x128xbf16> to vector<256x128xbf16>
      %cst_20 = arith.constant dense<0.000000e+00> : vector<16x128xf32>
      %21 = tpu.matmul %18, %20, %cst_20 {dimension_numbers = #tpu.dot_dimension_numbers<[1], [0], [0], [1], [0, 0, 1, 1], [], []>} : vector<16x256xbf16>, vector<256x128xbf16>, vector<16x128xf32> -> vector<16x128xf32>
      %c0_21 = arith.constant 0 : index
      %c0_22 = arith.constant 0 : index
      %c0_23 = arith.constant 0 : index
      %22 = vector.load %arg4[%c0_21, %c0_22, %c0_23] : memref<1x1x128xf32, #tpu.memory_space<vmem>>, vector<1x1x128xf32>
      %23 = vector.shape_cast %22 : vector<1x1x128xf32> to vector<1x128xf32>
      %24 = vector.broadcast %23 : vector<1x128xf32> to vector<16x128xf32>
      %25 = arith.addf %21, %24 : vector<16x128xf32>
      %cst_24 = arith.constant 0.000000e+00 : f32
      %26 = vector.broadcast %cst_24 : f32 to vector<16x128xf32>
      %27 = arith.maximumf %25, %26 : vector<16x128xf32>
      %c0_25 = arith.constant 0 : index
      %c0_26 = arith.constant 0 : index
      %28 = vector.load %arg8[%c0_25, %c0_26] : memref<16x128xf32, #tpu.memory_space<vmem>>, vector<16x128xf32>
      tpu.vector_store %arg8[%c0_25, %c0_26], %27 {strides = array<i32>} : memref<16x128xf32, #tpu.memory_space<vmem>>, vector<16x128xf32>,
    } else {
    }
    %c0 = arith.constant 0 : index
    %c0_1 = arith.constant 0 : index
    %3 = vector.load %arg8[%c0, %c0_1] : memref<16x128xf32, #tpu.memory_space<vmem>>, vector<16x128xf32>
    %4 = arith.truncf %3 : vector<16x128xf32> to vector<16x128xbf16>
    %c0_2 = arith.constant 0 : index
    %c0_3 = arith.constant 0 : index
    %c0_4 = arith.constant 0 : index
    %5 = vector.load %arg5[%c0_2, %c0_3, %c0_4] : memref<1x128x128xbf16, #tpu.memory_space<vmem>>, vector<1x128x128xbf16>
    %6 = vector.shape_cast %5 : vector<1x128x128xbf16> to vector<128x128xbf16>
    %cst = arith.constant dense<0.000000e+00> : vector<16x128xf32>
    %7 = tpu.matmul %4, %6, %cst {dimension_numbers = #tpu.dot_dimension_numbers<[1], [0], [0], [1], [0, 0, 1, 1], [], []>} : vector<16x128xbf16>, vector<128x128xbf16>, vector<16x128xf32> -> vector<16x128xf32>
    %c0_5 = arith.constant 0 : index
    %c0_6 = arith.constant 0 : index
    %c0_7 = arith.constant 0 : index
    %8 = vector.load %arg6[%c0_5, %c0_6, %c0_7] : memref<1x1x128xf32, #tpu.memory_space<vmem>>, vector<1x1x128xf32>
    %9 = vector.shape_cast %8 : vector<1x1x128xf32> to vector<1x128xf32>
    %10 = vector.broadcast %9 : vector<1x128xf32> to vector<16x128xf32>
    %11 = arith.addf %7, %10 : vector<16x128xf32>
    %cst_8 = arith.constant 0.000000e+00 : f32
    %12 = vector.broadcast %cst_8 : f32 to vector<16x128xf32>
    %13 = arith.maximumf %11, %12 : vector<16x128xf32>
    %14 = vector.shape_cast %13 : vector<16x128xf32> to vector<2x1x8x128xf32>
    %c0_9 = arith.constant 0 : index
    %c0_10 = arith.constant 0 : index
    %c0_11 = arith.constant 0 : index
    %c0_12 = arith.constant 0 : index
    %15 = vector.load %arg7[%c0_9, %c0_10, %c0_11, %c0_12] : memref<2x1x8x128xf32, #tpu.memory_space<vmem>>, vector<2x1x8x128xf32>
    tpu.vector_store %arg7[%c0_9, %c0_10, %c0_11, %c0_12], %14 {strides = array<i32>} : memref<2x1x8x128xf32, #tpu.memory_space<vmem>>, vector<2x1x8x128xf32>,
    return
  }
  func.func @transform_0(%arg0: i32, %arg1: i32) -> (i32, i32, i32, i32) {
    %c0_i32 = arith.constant 0 : i32
    %c0_i32_0 = arith.constant 0 : i32
    %c0_i32_1 = arith.constant 0 : i32
    %c0_i32_2 = arith.constant 0 : i32
    return %c0_i32, %arg0, %c0_i32_0, %c0_i32_1 : i32, i32, i32, i32
  }
  func.func @transform_1(%arg0: i32, %arg1: i32) -> (i32, i32, i32) {
    %c0_i32 = arith.constant 0 : i32
    %c0_i32_0 = arith.constant 0 : i32
    %c0_i32_1 = arith.constant 0 : i32
    return %arg0, %c0_i32, %c0_i32_0 : i32, i32, i32
  }
  func.func @transform_2(%arg0: i32, %arg1: i32) -> (i32, i32, i32) {
    %c0_i32 = arith.constant 0 : i32
    %c0_i32_0 = arith.constant 0 : i32
    %c0_i32_1 = arith.constant 0 : i32
    return %arg0, %c0_i32, %c0_i32_0 : i32, i32, i32
  }
  func.func @transform_3(%arg0: i32, %arg1: i32) -> (i32, i32, i32) {
    %c0_i32 = arith.constant 0 : i32
    %c0_i32_0 = arith.constant 0 : i32
    return %arg0, %c0_i32, %arg1 : i32, i32, i32
  }
  func.func @transform_4(%arg0: i32, %arg1: i32) -> (i32, i32, i32) {
    %c0_i32 = arith.constant 0 : i32
    %c0_i32_0 = arith.constant 0 : i32
    return %arg0, %c0_i32, %arg1 : i32, i32, i32
  }
  func.func @transform_5(%arg0: i32, %arg1: i32) -> (i32, i32, i32, i32) {
    %c0_i32 = arith.constant 0 : i32
    %c0_i32_0 = arith.constant 0 : i32
    %c0_i32_1 = arith.constant 0 : i32
    return %c0_i32, %arg0, %c0_i32_0, %arg1 : i32, i32, i32, i32
  }
}

</mosaic_0001>

<bundles_post_ra>
// kernel: tpu_custom_call.1
= control target key start
LH: loop header
LB: loop body
LE: loop exit
PB: predicated region body
PF: predicated region fallthrough
CT: control target
= control target key end

     0   :  { %s1597_s0 = inlined_call_operand.hbm [shape: f32[2,6,8,256], index: 0, kind: input, shape index: {}]   ;;  %s1598_s1 = inlined_call_operand.hbm [shape: bf16[6,256,128], index: 1, kind: input, shape index: {}]   ;;  %s1599_s2 = inlined_call_operand.hbm [shape: f32[6,1,128], index: 2, kind: input, shape index: {}]   ;;  %s1600_s3 = inlined_call_operand.hbm [shape: bf16[6,128,128], index: 3, kind: input, shape index: {}]   ;;  %s1601_s4 = inlined_call_operand.hbm [shape: f32[6,1,128], index: 4, kind: input, shape index: {}]   ;;  %s1602_s5 = inlined_call_operand.hbm [shape: f32[2,6,8,128], index: 5, kind: output, shape index: {}]  }
   0x1   :  { %1611 = sst [smem:[#allocation24_spill]] %s1597_s0 }
   0x2   :  { %1612 = sst [smem:[#allocation25_spill]] %s1598_s1 }
   0x3   :  { %1613 = sst [smem:[#allocation26_spill]] %s1600_s3 }
   0x4   :  { %10 = vsyncpa [#allocation4], 0 }
   0x5   :  { %12 = vsyncpa [#allocation4 + $0x1], 0 }
   0x6   :  { %13 = vsyncpa [#allocation7], 0 }
   0x7   :  { %15 = vsyncpa [#allocation7 + $0x1], 0 }
   0x8   :  { %16 = vsyncpa [#allocation10], 0 }
   0x9   :  { %18 = vsyncpa [#allocation10 + $0x1], 0 }
   0xa   :  { %19 = vsyncpa [#allocation5], 0 }
   0xb   :  { %21 = vsyncpa [#allocation5 + $0x1], 0  ;;  %s1372_s18 = smov 0   ;;  %s1374_s19 = smov 0  }
   0xc   :  { %s1376_s20 = smov 0   ;;  %s1378_s21 = smov 0  }
   0xd   :  { %s1380_s22 = smov 0   ;;  %s1382_s23 = smov 0  }
   0xe LB: > { %1614 = sst [smem:[#allocation17_spill]] %s1312_s18  ;;  %s1403_s24 = sadd.s32 4294967295, %s1332_s23   ;;  %s1332_s23 = sphi %s1382_s23, %s27_s23   ;;  %s1328_s22 = sphi %s1380_s22, %s1640_s22   ;;  %s1324_s21 = sphi %s1378_s21, %s1639_s21   ;;  %s1320_s20 = sphi %s1376_s20, %s1635_s20   ;;  %s1316_s19 = sphi %s1374_s19, %s1638_s19   ;;  %s1312_s18 = sphi %s1372_s18, %s1637_s18  }
   0xf   : > { %1615 = sst [smem:[#allocation18_spill]] %s1320_s20  ;;  %s856_s25 = sadd.s32 4294967294, %s1332_s23  }
  0x10   : > { %1616 = sst [smem:[#allocation19_spill]] %s1332_s23  ;;  %s39_s26 = sadd.s32 1, %s1328_s22 }
  0x11   : > { %s46_s27 = sadd.s32 1, %s1320_s20  ;;  %p41_p0 = scmp.ge.s32.totalorder %s39_s26, 6 }
  0x12   : > { %p53_p1 = scmp.ne.s32.totalorder %s1320_s20, %s1316_s19  ;;  %p54_p2 = scmp.eq.s32.totalorder %s1332_s23, 0 }
  0x13   : > { %p59_p3 = scmp.ne.s32.totalorder %s1316_s19, %s1312_s18  ;;  %s1642_s26 = smov (%p41_p0, %s39_s26), 0 }
  0x14   : > { %1617 = sst [smem:[#allocation20_spill]] %s1642_s26  ;;  %p1415_p4 = por %p54_p2, %p53_p1 }
  0x15   : > { %p60_p5 = scmp.eq.s32.totalorder %s1403_s24, 0  ;;  %s43_s29 = ssub.s32 %s1328_s22, %s1642_s26 }
  0x16   : > { %p193_p6 = scmp.eq.s32.totalorder %s1403_s24, 5  ;;  %p44_p7 = scmp.eq.s32.totalorder %s43_s29, 0 }
  0x17   : > { %p1423_p8 = por %p60_p5, %p59_p3  ;;  %p199_p10 = scmp.eq.s32.totalorder %s856_s25, 5 }
  0x18   : > { %p1427_p9 = por %p193_p6, %p53_p1  ;;  %p1032_p12 = scmp.lt.s32.totalorder %s1332_s23, 6 }
  0x19   : > { %s1432_s7 = scalar_select %p44_p7, %s1320_s20, %s46_s27  }
  0x1a   : > { %s1620_s6 = scalar_select %p1427_p9, 1, 0 }
  0x1b   : > { %1622 = sst [smem:[#allocation22_spill]] %s1432_s7  ;;  %p1434_p11 = por %p199_p10, %p59_p3 }
  0x1c   : > { %1621 = sst [smem:[#allocation21_spill]] %s1620_s6  ;;  %s1440_s9 = sand.u32 1, %s1320_s20  }
  0x1d   : > { %s1623_s8 = scalar_select %p1434_p11, 1, 0 }
  0x1e   : > { %s241_s10 = sand.u32 1, %s1332_s23   ;;  %s862_s11 = sshll.u32 %s1440_s9, 7 }
  0x1f   : > { %1624 = sst [smem:[#allocation23_spill]] %s1623_s8  ;;  %p1446_p13 = pnand %p1032_p12, %p1415_p4 }
  0x20   : > { %s974_s13 = sshll.u32 %s1328_s22, 7  ;;  %s1626_s1 = sld [smem:[#allocation25_spill]] }
  0x21   : > { %s245_s25 = scalar_lea.vmem [#allocation6], %s862_s11  ;;  %s1454_s29 = scalar_lea.sflag [#allocation7], %s241_s10 }
  0x22   : > { %s253_s27 = sshll.u32 %s245_s25, 4  ;;  %s1334_s28 = smov 64   ;;  %s254_s27 = int_to_ptr.vmem [resolvable:$true] %s253_s27 }
  0x23   : > { %s1335_s26 = smov 4   ;;  %p868_p0 = scmp.ge.s32.totalorder %s1332_s23, 1 }
  0x24   : > { %p319_p1 = scmp.lt.s32.totalorder %s1332_s23, 7  ;;  %s865_s7 = sshll.u32 %s1440_s9, 6 }
  0x25   : > { %s975_s11 = sshll.u32 %s1328_s22, 6  ;;  %s284_s14 = scalar_lea.vmem [#allocation9], %s865_s7 }
  0x26   : > { %s250_s16 = scalar_lea.hbm %s1626_s1, %s974_s13  ;;  %p1462_p2 = pnand %p868_p0, %p319_p1 }
  0x27   : > { %s251_s17 = sshll.u32 %s250_s16, 4  ;;  %s293_s15 = sshll.u32 %s284_s14, 4  ;;  %s252_s17 = int_to_ptr.hbm [resolvable:$true] %s251_s17  ;;  %s294_s15 = int_to_ptr.vmem [resolvable:$true] %s293_s15 }
  0x28   : > { %1018 = dma.hbm_to_vmem [thread:$0]  (!%p1446_p13), %s252_s17, 2048, %s254_s27, %s1454_s29, %s1334_s28, %s1334_s28, %s1335_s26  }
  0x29   : > { %s1628_s3 = sld [smem:[#allocation26_spill]]  ;;  %s1470_s17 = scalar_lea.sflag [#allocation10], %s241_s10 }
  0x2a   : > { %s859_s27 = sshll.u32 %s1440_s9, 5  ;;  %s973_s8 = sshll.u32 %s1328_s22, 4 }
  0x2b   : > { %s1629_s0 = sld [smem:[#allocation24_spill]]  ;;  %s223_s23 = scalar_lea.vmem [#allocation3], %s859_s27 }
  0x2c   : > { %s220_s10 = scalar_lea.sflag [#allocation4], %s1440_s9  ;;  %s1336_s16 = smov 1536  }
  0x2d   : > { %s1337_s25 = smov 256  }
  0x2f   : > { %s290_s1 = scalar_lea.hbm %s1628_s3, %s975_s11  ;;  %s231_s11 = sshll.u32 %s223_s23, 4  ;;  %s232_s11 = int_to_ptr.vmem [resolvable:$true] %s231_s11 }
  0x30   : > { %s291_s20 = sshll.u32 %s290_s1, 4  ;;  %s306_s3 = scalar_lea.vmem [#allocation11], %s1440_s9  ;;  %s292_s20 = int_to_ptr.hbm [resolvable:$true] %s291_s20 }
  0x31   : > { %1024 = dma.hbm_to_vmem [thread:$0]  (!%p1446_p13), %s292_s20, 1024, %s294_s15, %s1470_s17, %s1334_s28, %s1334_s28, %s1335_s26  }
  0x32   : > { %s228_s14 = scalar_lea.hbm %s1629_s0, %s973_s8  ;;  %s1338_s20 = smov 16  }
  0x33   : > { %s229_s1 = sshll.u32 %s228_s14, 4  ;;  %s269_s8 = scalar_lea.hbm %s1599_s2, %s1328_s22  ;;  %s230_s1 = int_to_ptr.hbm [resolvable:$true] %s229_s1 }
  0x34   : > { %1015 = dma.hbm_to_vmem [thread:$0]  (!%p1446_p13), %s230_s1, 512, %s232_s11, %s220_s10, %s1336_s16, %s1337_s25, %s1338_s20  }
  0x35   : > { %s271_s28 = sshll.u32 %s269_s8, 4  ;;  %s266_s15 = scalar_lea.vmem [#allocation8], %s1440_s9  ;;  %s272_s28 = int_to_ptr.hbm [resolvable:$true] %s271_s28 }
  0x36   : > { %s273_s23 = sshll.u32 %s266_s15, 4  ;;  %s310_s14 = scalar_lea.hbm %s1601_s4, %s1328_s22  ;;  %s274_s23 = int_to_ptr.vmem [resolvable:$true] %s273_s23 }
  0x37   : > { %1021 = dma.hbm_to_vmem [thread:$0]  (!%p1446_p13), %s272_s28, 16, %s274_s23, %s1454_s29  }
  0x38   : > { %s312_s0 = sshll.u32 %s310_s14, 4  ;;  %s314_s6 = sshll.u32 %s306_s3, 4  ;;  %s313_s0 = int_to_ptr.hbm [resolvable:$true] %s312_s0  ;;  %s315_s6 = int_to_ptr.vmem [resolvable:$true] %s314_s6 }
  0x39   : > { %1027 = dma.hbm_to_vmem [thread:$0]  (!%p1446_p13), %s313_s0, 16, %s315_s6, %s1470_s17  }
  0x3a   : > { %323 = sbr.rel (%p1462_p2) target bundleno = 393 (0x189), region = 40  ;;  %s1502_s11 = sand.u32 (!%p1462_p2), 1, %s1316_s19  }
  0x3b   : > { %s869_s29 = sshll.u32 (!%p1462_p2), %s1502_s11, 5  ;;  %s326_s1 = scalar_lea.sflag (!%p1462_p2), [#allocation4], %s1502_s11 }
  0x3c   : > { %s1506_s10 = scalar_lea.vmem (!%p1462_p2), [#allocation3], %s869_s29 }
  0x3f   : > { %1295 = dma.done.wait (%p1423_p8), %s326_s1, 512  }
  0x40   : > { %1297 = vsyncadd (%p1423_p8), %s326_s1, 4294966784  ;;  %s335_s0 = sand.u32 1, %s1403_s24   ;;  %s870_s3 = sshll.u32 %s1502_s11, 7 }
  0x41   : > { %s336_s6 = scalar_lea.sflag [#allocation7], %s335_s0  ;;  %s1514_s9 = scalar_lea.vmem [#allocation6], %s870_s3 }
  0x42   : > { %1299 = dma.done.wait (%p1423_p8), %s336_s6, 2064  }
  0x43   : > { %1301 = vsyncadd (%p1423_p8), %s336_s6, 4294965232  ;;  %s871_s12 = sshll.u32 %s1502_s11, 6  ;;  %s348_s13 = scalar_lea.vmem [#allocation8], %s1502_s11 }
  0x44   : > { %s355_s17 = scalar_lea.sflag [#allocation10], %s335_s0  ;;  %s1522_s16 = scalar_lea.vmem [#allocation9], %s871_s12 }
  0x45   : > { %1303 = dma.done.wait (%p1423_p8), %s355_s17, 1040  }
  0x46   : > { %1305 = vsyncadd (%p1423_p8), %s355_s17, 4294966256  ;;  %v983_v0 = vld [vmem:[%s1514_s9 + $0x38] sm:$0xff]  ;;  %v982_v2 = vld [vmem:[%s1514_s9 + $0x30] sm:$0xff]  ;;  %s367_s24 = scalar_lea.vmem [#allocation11], %s1502_s11  ;;  %s872_s30 = sshll.u32 %s1502_s11, 4 }
  0x47   : > { %v991_v1 = vld [vmem:[%s1514_s9 + $0x78] sm:$0xff]  ;;  %555 = vmatpush.bf16.msra.mxu0 %v983_v0  ;;  %v990_v3 = vld [vmem:[%s1514_s9 + $0x70] sm:$0xff]  ;;  %v981_v4 = vld [vmem:[%s1514_s9 + $0x28] sm:$0xff]  ;;  %s970_s25 = sshll.u32 %s1324_s21, 3  ;;  %s412_s28 = scalar_lea.vmem [#allocation12], %s872_s30 }
  0x48   : > { %569 = vmatpush.bf16.msra.mxu1 %v991_v1  ;;  %v989_v5 = vld [vmem:[%s1514_s9 + $0x68] sm:$0xff]  ;;  %v999_v6 = vld [vmem:[%s1522_s16 + $0x38] sm:$0xff]  ;;  %v998_v7 = vld [vmem:[%s1522_s16 + $0x30] sm:$0xff]  ;;  %s688_s18 = scalar_lea.hbm %s1602_s5, %s970_s25  ;;  %s689_s15 = sshll.u32 %s412_s28, 4  ;;  %s690_s15 = int_to_ptr.vmem [resolvable:$true] %s689_s15 }
  0x49   : > { %658 = vmatpush.bf16.msra.mxu2 %v999_v6  ;;  %v980_v8 = vld [vmem:[%s1514_s9 + $0x20] sm:$0xff]  ;;  %v997_v10 = vld [vmem:[%s1522_s16 + $0x28] sm:$0xff]  ;;  %v979_v11 = vld [vmem:[%s1514_s9 + $0x18] sm:$0xff]  ;;  %s691_s23 = sshll.u32 %s688_s18, 4  ;;  %s677_s27 = scalar_lea.sflag [#allocation5], %s1502_s11  ;;  %s692_s23 = int_to_ptr.hbm [resolvable:$true] %s691_s23 }
  0x4a   : > { %v988_v9 = vld [vmem:[%s1514_s9 + $0x60] sm:$0xff]  ;;  %v987_v12 = vld [vmem:[%s1514_s9 + $0x58] sm:$0xff]  ;;  %v978_v14 = vld [vmem:[%s1514_s9 + $0x10] sm:$0xff]  ;;  %s1256_s7 = sshra.s32 %s692_s23, 4  ;;  %s1262_s1 = scalar_lea.hbm %s1602_s5, 96  ;;  %s1257_s7 = int_to_ptr.hbm [resolvable:$true] %s1256_s7 }
  0x4b   : > { %556 = vmatpush.bf16.msra.mxu0 %v982_v2  ;;  %v996_v13 = vld [vmem:[%s1522_s16 + $0x20] sm:$0xff]  ;;  %v986_v15 = vld [vmem:[%s1514_s9 + $0x50] sm:$0xff]  ;;  %v420_v23 = vld [vmem:[%s1506_s10 + $0x18] sm:$0xff]  ;;  %s1258_s21 = scalar_lea.hbm %s1257_s7, 16  ;;  %p1263_p6 = scmp.lt.s32.totalorder %s1257_s7, %s1602_s5 }
  0x4c   : > { %570 = vmatpush.bf16.msra.mxu1 %v990_v3  ;;  %v977_v16 = vld [vmem:[%s1514_s9 + $0x8] sm:$0xff]  ;;  %v976_v18 = vld [vmem:[%s1514_s9] sm:$0xff]  ;;  %v419_v21 = vld [vmem:[%s1506_s10 + $0x10] sm:$0xff]  ;;  %p1259_p3 = scmp.ne.s32.totalorder %s1257_s7, %s1258_s21  ;;  %p1264_p7 = scmp.lt.s32.totalorder %s1262_s1, %s1258_s21 }
  0x4d   : > { %659 = vmatpush.bf16.msra.mxu2 %v998_v7  ;;  %v985_v17 = vld [vmem:[%s1514_s9 + $0x48] sm:$0xff]  ;;  %v984_v19 = vld [vmem:[%s1514_s9 + $0x40] sm:$0xff]  ;;  %v994_v27 = vld [vmem:[%s1522_s16 + $0x10] sm:$0xff] }
  0x4e   : > { %v417_v20 = vld [vmem:[%s1506_s10] sm:$0xff]  ;;  %v418_v22 = vld [vmem:[%s1506_s10 + $0x8] sm:$0xff]  ;;  %p1260_p4 = pnand %p1259_p3, %p1427_p9  ;;  %p1265_p8 = por %p1264_p7, %p1263_p6 }
  0x4f   : > { %557 = vmatpush.bf16.msra.mxu0 %v981_v4  ;;  %v421_v24 = vpack.c.bf16 %v419_v21, %v417_v20  ;;  %v422_v25 = vpack.c.bf16 %v420_v23, %v418_v22  ;;  %v995_v26 = vld [vmem:[%s1522_s16 + $0x18] sm:$0xff]  ;;  %v993_v28 = vld [vmem:[%s1522_s16 + $0x8] sm:$0xff]  ;;  %v992_v29 = vld [vmem:[%s1522_s16] sm:$0xff] }
  0x50   : > { %571 = vmatpush.bf16.msra.mxu1 %v989_v5  ;;  %v1090_v32 = vld [vmem:[%s348_s13] ss:$0 sm:$0xff]  ;;  %p1261_p5 = pneg %p1260_p4 }
  0x51   : > { %660 = vmatpush.bf16.msra.mxu2 %v997_v10  ;;  %v1091_v42 = vld [vmem:[%s367_s24] ss:$0 sm:$0xff] }
  0x52   : > { %p1266_p10 = pnand %p1265_p8, %p1261_p5 }
  0x53   : > { %558 = vmatpush.bf16.msra.mxu0 %v980_v8 }
  0x54   : > { %572 = vmatpush.bf16.msra.mxu1 %v988_v9 }
  0x55   : > { %661 = vmatpush.bf16.msra.mxu2 %v996_v13 }
  0x57   : > { %559 = vmatpush.bf16.msra.mxu0 %v979_v11 }
  0x58   : > { %573 = vmatpush.bf16.msra.mxu1 %v987_v12 }
  0x59   : > { %662 = vmatpush.bf16.msra.mxu2 %v995_v26 }
  0x5b   : > { %560 = vmatpush.bf16.msra.mxu0 %v978_v14 }
  0x5c   : > { %574 = vmatpush.bf16.msra.mxu1 %v986_v15 }
  0x5d   : > { %663 = vmatpush.bf16.msra.mxu2 %v994_v27 }
  0x5f   : > { %561 = vmatpush.bf16.msra.mxu0 %v977_v16 }
  0x60   : > { %575 = vmatpush.bf16.msra.mxu1 %v985_v17 }
  0x61   : > { %664 = vmatpush.bf16.msra.mxu2 %v993_v28 }
  0x63   : > { %562 = vmatpush.bf16.msra.mxu0 %v976_v18 }
  0x64   : > { %576 = vmatpush.bf16.msra.mxu1 %v984_v19 }
  0x65   : > { %665 = vmatpush.bf16.msra.mxu2 %v992_v29 }
  0x66   : > { %563 = vmatmul.bf16.vlgmr.msra.gmra.mxu0 %v421_v24 }
  0x67   : > { %577 = vmatmul.bf16.vlgmr.msra.gmra.mxu1 %v422_v25 }
  0xe3   : > { %v564_v30 = vpop.f32.mrf.mxu0 }
  0xe4   : > { %v578_v31 = vpop.f32.mrf.mxu1  ;;  %v565_v33 = vadd.f32 %v1090_v32, %v564_v30 }
  0xe6   : > { %v579_v35 = vadd.f32 %v578_v31, %v565_v33 }
  0xe8   : > { %v583_v39 = vmax.f32 %v579_v35, 0.0 }
  0xeb   : > { %v566_v34 = vpop.f32.mrf.mxu0 }
  0xec   : > { %v567_v36 = vadd.f32 %v1090_v32, %v566_v34  ;;  %v580_v37 = vpop.f32.mrf.mxu1 }
  0xee   : > { %v581_v38 = vadd.f32 %v580_v37, %v567_v36 }
  0xf0   : > { %v584_v40 = vmax.f32 %v581_v38, 0.0 }
  0xf2   : > { %v589_v41 = vpack.c.bf16 %v584_v40, %v583_v39 }
  0xf4   : > { %666 = vmatmul.bf16.vlgmr.msra.gmra.mxu2 %v589_v41 }
 0x177   : > { %v667_v43 = vpop.f32.mrf.mxu2 }
 0x178   : > { %v668_v44 = vadd.f32 %v1091_v42, %v667_v43 }
 0x17a   : > { %v672_v45 = vmax.f32 %v668_v44, 0.0 }
 0x17c   : > { %674 = vst [vmem:[%s412_s28] sm:$0xff] %v672_v45 }
 0x17f   : > { %v669_v46 = vpop.f32.mrf.mxu2 }
 0x180   : > { %v670_v47 = vadd.f32 %v1091_v42, %v669_v46 }
 0x182   : > { %v673_v48 = vmax.f32 %v670_v47, 0.0 }
 0x184   : > { %675 = vst [vmem:[%s412_s28 + $0x8] sm:$0xff] %v673_v48 }
 0x185   : > { %1269 = shalt.err (!%p1266_p10)
}
 0x186   : > { %s1339_s11 = smov 128   ;;  %s1340_s3 = smov 768  }
 0x187   : > { %s1341_s6 = smov 8  }
 0x188   : > { %1010 = dma.vmem_to_hbm [thread:$0]  (%p1427_p9), %s690_s15, 256, %s692_s23, %s677_s27, %s1339_s11, %s1340_s3, %s1341_s6  }
 0x189 PF: > { %s1631_s9 = sld [smem:[#allocation19_spill]] }
 0x18a   : > { %s1632_s12 = sld [smem:[#allocation17_spill]] }
 0x18f   : > { %p1033_p12 = scmp.ge.s32.totalorder %s1631_s9, 2 }
 0x190   : > { %s706_s17 = sand.u32 1, %s1632_s12  }
 0x191   : > { %p1029_p13 = pnand %p1033_p12, %p1434_p11  ;;  %s707_s16 = scalar_lea.sflag [#allocation5], %s706_s17 }
 0x193   : > { %p1030_p0 = pneg %p1029_p13 }
 0x195   : > { %1307 = dma.done.wait (%p1030_p0), %s707_s16, 256  }
 0x196   : > { %1309 = vsyncadd (%p1030_p0), %s707_s16, 4294967040  ;;  %s27_s23 = sadd.s32 1, %s1631_s9   ;;  %s1634_s24 = sld [smem:[#allocation18_spill]] }
 0x197   : > { %p24_p1 = scmp.ge.s32.totalorder %s27_s23, 8   ;;  %s1635_s20 = sld [smem:[#allocation22_spill]] }
 0x198   : > { %s1636_s30 = sld [smem:[#allocation20_spill]]  ;;  %s1637_s18 = smov %s1316_s19 }
 0x199   : > { %s1639_s21 = smov %s1328_s22 }
 0x19a   :  { %26 = sbr.rel (!%p24_p1) target bundleno = 14 (0xe), region = 137 }
 0x19c   : > { %s1638_s19 = smov %s1634_s24 }
 0x19e   : > { %s1640_s22 = smov %s1636_s30 }
 0x19f   :  { %713 = vsyncpa [#allocation4], 1 }
 0x1a0   :  { %715 = vsyncpa [#allocation4 + $0x1], 1 }
 0x1a1   :  { %716 = vsyncpa [#allocation7], 1 }
 0x1a2   :  { %718 = vsyncpa [#allocation7 + $0x1], 1 }
 0x1a3   :  { %719 = vsyncpa [#allocation10], 1 }
 0x1a4   :  { %721 = vsyncpa [#allocation10 + $0x1], 1 }
 0x1a5   :  { %722 = vsyncpa [#allocation5], 1 }
 0x1a6   :  { %724 = vsyncpa [#allocation5 + $0x1], 1 }

</bundles_post_ra>
